<compile_context>
chip_gen: v5e
topology: v5e:2x2
jax: 0.10.0
libtpu: 0.0.40
codegen_flags: <defaults>
</compile_context>

<pallas_src>
import math
from functools import partial

import jax
import jax.numpy as jnp
from jax.experimental import pallas as pl
from jax.experimental.pallas import tpu as pltpu

_LANE = 128
_SUBLANE = 8


def _round_up(x, m):
    return ((x + m - 1) // m) * m


def actor_kernel(x_ref, w1_ref, b1_ref, w2_ref, b2_ref, w3_ref, b3_ref,
                 amax_ref, out_ref, *, matmul_dtype):
    # One batch tile per grid step: three MXU matmuls (weights VMEM-resident
    # across the whole grid), VPU bias+ReLU, EUP tanh, scalar scale from SMEM.
    def mm(x, w_ref):
        return jnp.dot(x.astype(matmul_dtype),
                       w_ref[...].astype(matmul_dtype),
                       preferred_element_type=jnp.float32)

    x = x_ref[...]
    h1 = jnp.maximum(mm(x, w1_ref) + b1_ref[...], 0.0)
    h2 = jnp.maximum(mm(h1, w2_ref) + b2_ref[...], 0.0)
    logits = mm(h2, w3_ref) + b3_ref[...]
    # Padded action columns have zero w3/b3 -> tanh(0)*amax = 0 (sliced later).
    out_ref[...] = jnp.tanh(logits) * amax_ref[0, 0]


def actor_forward(state, w1, b1, w2, b2, w3, b3, max_action, *,
                  tile_b=512, use_bf16_matmul=False,
                  vmem_limit_bytes=32 << 20):
    """Fused Actor forward. max_action is a scalar multiplier (as in DDPG)."""
    B, S = state.shape
    H = w1.shape[1]
    A = w3.shape[1]

    # ---- lane-dense output: pad action dim to a multiple of 128 (zeros) ----
    A_pad = _round_up(A, _LANE)
    w3p = jnp.pad(w3, ((0, 0), (0, A_pad - A))) if A_pad != A else w3
    b3p = jnp.pad(b3, ((0, 0), (0, A_pad - A))) if A_pad != A else b3

    # ---- batch tiling: TILE_B multiple of 8, B padded to a multiple of it ---
    tile_b = _round_up(min(tile_b, _round_up(B, _SUBLANE)), _SUBLANE)
    B_pad = _round_up(B, tile_b)
    state_p = jnp.pad(state, ((0, B_pad - B), (0, 0))) if B_pad != B else state

    amax = jnp.asarray(max_action, jnp.float32).reshape(1, 1)

    grid = (pl.cdiv(B_pad, tile_b),)
    matmul_dtype = jnp.bfloat16 if use_bf16_matmul else jnp.float32

    flops = 2 * B_pad * (S * H + H * H + H * A_pad)
    bytes_accessed = 4 * (B_pad * S + S * H + H + H * H + H
                          + H * A_pad + A_pad + B_pad * A_pad)

    resident = lambda i: (0, 0)   # weights/biases: same block every grid step

    out = pl.pallas_call(
        partial(actor_kernel, matmul_dtype=matmul_dtype),
        out_shape=jax.ShapeDtypeStruct((B_pad, A_pad), jnp.float32),
        grid=grid,
        in_specs=[
            pl.BlockSpec((tile_b, S), lambda i: (i, 0)),        # state tile
            pl.BlockSpec((S, H), resident),                     # w1 (resident)
            pl.BlockSpec((1, H), resident),                     # b1
            pl.BlockSpec((H, H), resident),                     # w2
            pl.BlockSpec((1, H), resident),                     # b2
            pl.BlockSpec((H, A_pad), resident),                 # w3 (padded)
            pl.BlockSpec((1, A_pad), resident),                 # b3 (padded)
            pl.BlockSpec(memory_space=pltpu.MemorySpace.SMEM),  # max_action
        ],
        out_specs=pl.BlockSpec((tile_b, A_pad), lambda i: (i, 0)),
        compiler_params=pltpu.CompilerParams(
            dimension_semantics=("parallel",),
            vmem_limit_bytes=vmem_limit_bytes,
        ),
        cost_estimate=pl.CostEstimate(
            flops=flops,
            transcendentals=B_pad * A_pad,
            bytes_accessed=bytes_accessed,
        ),
    )(state_p, w1, b1, w2, b2, w3p, b3p, amax)

    return out[:B, :A]


def init_actor_params(key, state_dim, action_dim, hidden=256):
    """Deterministic init mimicking nn.Linear's U(-1/sqrt(fan_in), 1/sqrt(fan_in))."""
    keys = jax.random.split(key, 6)

    def linear(kw, kb, fan_in, fan_out):
        bound = 1.0 / math.sqrt(fan_in)
        w = jax.random.uniform(kw, (fan_in, fan_out), jnp.float32, -bound, bound)
        b = jax.random.uniform(kb, (1, fan_out), jnp.float32, -bound, bound)
        return w, b

    w1, b1 = linear(keys[0], keys[1], state_dim, hidden)
    w2, b2 = linear(keys[2], keys[3], hidden, hidden)
    w3, b3 = linear(keys[4], keys[5], hidden, action_dim)
    return w1, b1, w2, b2, w3, b3


def reference_forward(state, w1, b1, w2, b2, w3, b3, max_action):
    h1 = jnp.maximum(state @ w1 + b1, 0.0)
    h2 = jnp.maximum(h1 @ w2 + b2, 0.0)
    return jnp.tanh(h2 @ w3 + b3) * max_action


if __name__ == "__main__":
    # Small shapes consistent with the module: batch=2 states of dim 8, 4 actions.
    batch, state_dim, action_dim = 2, 8, 4
    max_action_value = 2.0

    key = jax.random.PRNGKey(0)
    k_state, k_params, k_state2 = jax.random.split(key, 3)

    state = jax.random.normal(k_state, (batch, state_dim), jnp.float32)
    w1, b1, w2, b2, w3, b3 = init_actor_params(k_params, state_dim, action_dim)

    out = actor_forward(state, w1, b1, w2, b2, w3, b3, max_action_value)
    out = jax.block_until_ready(out)
    ref = reference_forward(state, w1, b1, w2, b2, w3, b3, max_action_value)
    assert out.shape == (batch, action_dim)
    assert jnp.allclose(out, ref, atol=1e-5, rtol=1e-5), "mismatch vs JAX reference"

    # Second check: batch that is not a multiple of the tile, exercising the
    # multi-tile grid + padding/slicing path.
    batch2 = 300
    state2 = jax.random.normal(k_state2, (batch2, state_dim), jnp.float32)
    out2 = actor_forward(state2, w1, b1, w2, b2, w3, b3, max_action_value,
                         tile_b=128)
    out2 = jax.block_until_ready(out2)
    ref2 = reference_forward(state2, w1, b1, w2, b2, w3, b3, max_action_value)
    assert out2.shape == (batch2, action_dim)
    assert jnp.allclose(out2, ref2, atol=1e-5, rtol=1e-5), "mismatch (tiled path)"

    print("KERNEL_OK")
</pallas_src>

<mosaic_0001>
module attributes {stable_mosaic.version = 11 : i64} {
  func.func @actor_kernel(%arg0: i32, %arg1: memref<8x8xf32, #tpu.memory_space<vmem>>, %arg2: memref<8x256xf32, #tpu.memory_space<vmem>>, %arg3: memref<1x256xf32, #tpu.memory_space<vmem>>, %arg4: memref<256x256xf32, #tpu.memory_space<vmem>>, %arg5: memref<1x256xf32, #tpu.memory_space<vmem>>, %arg6: memref<256x128xf32, #tpu.memory_space<vmem>>, %arg7: memref<1x128xf32, #tpu.memory_space<vmem>>, %arg8: memref<1x1xf32, #tpu.memory_space<smem>>, %arg9: memref<8x128xf32, #tpu.memory_space<vmem>>) attributes {dimension_semantics = [#tpu.dimension_semantics<parallel>], iteration_bounds = array<i64: 1>, scalar_prefetch = 0 : i64, scratch_operands = 0 : i64, tpu.core_type = #tpu.core_type<tc>, window_params = [{transform_indices = @transform_0, window_bounds = array<i64: 8, 8>}, {pipeline_mode = #tpu.pipeline_mode<synchronous>, transform_indices = @transform_1, window_bounds = array<i64: 8, 256>}, {pipeline_mode = #tpu.pipeline_mode<synchronous>, transform_indices = @transform_2, window_bounds = array<i64: 1, 256>}, {pipeline_mode = #tpu.pipeline_mode<synchronous>, transform_indices = @transform_3, window_bounds = array<i64: 256, 256>}, {pipeline_mode = #tpu.pipeline_mode<synchronous>, transform_indices = @transform_4, window_bounds = array<i64: 1, 256>}, {pipeline_mode = #tpu.pipeline_mode<synchronous>, transform_indices = @transform_5, window_bounds = array<i64: 256, 128>}, {pipeline_mode = #tpu.pipeline_mode<synchronous>, transform_indices = @transform_6, window_bounds = array<i64: 1, 128>}, {transform_indices = @transform_7, window_bounds = array<i64: 1, 1>}, {transform_indices = @transform_8, window_bounds = array<i64: 8, 128>}]} {
    %c0 = arith.constant 0 : index
    %c0_0 = arith.constant 0 : index
    %0 = vector.load %arg1[%c0, %c0_0] : memref<8x8xf32, #tpu.memory_space<vmem>>, vector<8x8xf32>
    %c0_1 = arith.constant 0 : index
    %c0_2 = arith.constant 0 : index
    %1 = vector.load %arg2[%c0_1, %c0_2] : memref<8x256xf32, #tpu.memory_space<vmem>>, vector<8x256xf32>
    %cst = arith.constant dense<0.000000e+00> : vector<8x256xf32>
    %2 = tpu.matmul %0, %1, %cst {dimension_numbers = #tpu.dot_dimension_numbers<[1], [0], [0], [1], [0, 0, 1, 1], [], []>} : vector<8x8xf32>, vector<8x256xf32>, vector<8x256xf32> -> vector<8x256xf32>
    %c0_3 = arith.constant 0 : index
    %c0_4 = arith.constant 0 : index
    %3 = vector.load %arg3[%c0_3, %c0_4] : memref<1x256xf32, #tpu.memory_space<vmem>>, vector<1x256xf32>
    %4 = vector.broadcast %3 : vector<1x256xf32> to vector<8x256xf32>
    %5 = arith.addf %2, %4 : vector<8x256xf32>
    %cst_5 = arith.constant 0.000000e+00 : f32
    %6 = vector.broadcast %cst_5 : f32 to vector<8x256xf32>
    %7 = arith.maximumf %5, %6 : vector<8x256xf32>
    %c0_6 = arith.constant 0 : index
    %c0_7 = arith.constant 0 : index
    %8 = vector.load %arg4[%c0_6, %c0_7] : memref<256x256xf32, #tpu.memory_space<vmem>>, vector<256x256xf32>
    %cst_8 = arith.constant dense<0.000000e+00> : vector<8x256xf32>
    %9 = tpu.matmul %7, %8, %cst_8 {dimension_numbers = #tpu.dot_dimension_numbers<[1], [0], [0], [1], [0, 0, 1, 1], [], []>} : vector<8x256xf32>, vector<256x256xf32>, vector<8x256xf32> -> vector<8x256xf32>
    %c0_9 = arith.constant 0 : index
    %c0_10 = arith.constant 0 : index
    %10 = vector.load %arg5[%c0_9, %c0_10] : memref<1x256xf32, #tpu.memory_space<vmem>>, vector<1x256xf32>
    %11 = vector.broadcast %10 : vector<1x256xf32> to vector<8x256xf32>
    %12 = arith.addf %9, %11 : vector<8x256xf32>
    %cst_11 = arith.constant 0.000000e+00 : f32
    %13 = vector.broadcast %cst_11 : f32 to vector<8x256xf32>
    %14 = arith.maximumf %12, %13 : vector<8x256xf32>
    %c0_12 = arith.constant 0 : index
    %c0_13 = arith.constant 0 : index
    %15 = vector.load %arg6[%c0_12, %c0_13] : memref<256x128xf32, #tpu.memory_space<vmem>>, vector<256x128xf32>
    %cst_14 = arith.constant dense<0.000000e+00> : vector<8x128xf32>
    %16 = tpu.matmul %14, %15, %cst_14 {dimension_numbers = #tpu.dot_dimension_numbers<[1], [0], [0], [1], [0, 0, 1, 1], [], []>} : vector<8x256xf32>, vector<256x128xf32>, vector<8x128xf32> -> vector<8x128xf32>
    %c0_15 = arith.constant 0 : index
    %c0_16 = arith.constant 0 : index
    %17 = vector.load %arg7[%c0_15, %c0_16] : memref<1x128xf32, #tpu.memory_space<vmem>>, vector<1x128xf32>
    %18 = vector.broadcast %17 : vector<1x128xf32> to vector<8x128xf32>
    %19 = arith.addf %16, %18 : vector<8x128xf32>
    %20 = math.tanh %19 : vector<8x128xf32>
    %c0_17 = arith.constant 0 : index
    %c0_18 = arith.constant 0 : index
    %21 = memref.load %arg8[%c0_17, %c0_18] : memref<1x1xf32, #tpu.memory_space<smem>>
    %22 = vector.broadcast %21 : f32 to vector<8x128xf32>
    %23 = arith.mulf %20, %22 : vector<8x128xf32>
    %c0_19 = arith.constant 0 : index
    %c0_20 = arith.constant 0 : index
    %24 = vector.load %arg9[%c0_19, %c0_20] : memref<8x128xf32, #tpu.memory_space<vmem>>, vector<8x128xf32>
    tpu.vector_store %arg9[%c0_19, %c0_20], %23 {strides = array<i32>} : memref<8x128xf32, #tpu.memory_space<vmem>>, vector<8x128xf32>,
    return
  }
  func.func @transform_0(%arg0: i32) -> (i32, i32) {
    %c0_i32 = arith.constant 0 : i32
    %c0_i32_0 = arith.constant 0 : i32
    return %arg0, %c0_i32 : i32, i32
  }
  func.func @transform_1(%arg0: i32) -> (i32, i32) {
    %c0_i32 = arith.constant 0 : i32
    %c0_i32_0 = arith.constant 0 : i32
    %c0_i32_1 = arith.constant 0 : i32
    return %c0_i32, %c0_i32_0 : i32, i32
  }
  func.func @transform_2(%arg0: i32) -> (i32, i32) {
    %c0_i32 = arith.constant 0 : i32
    %c0_i32_0 = arith.constant 0 : i32
    %c0_i32_1 = arith.constant 0 : i32
    return %c0_i32, %c0_i32_0 : i32, i32
  }
  func.func @transform_3(%arg0: i32) -> (i32, i32) {
    %c0_i32 = arith.constant 0 : i32
    %c0_i32_0 = arith.constant 0 : i32
    %c0_i32_1 = arith.constant 0 : i32
    return %c0_i32, %c0_i32_0 : i32, i32
  }
  func.func @transform_4(%arg0: i32) -> (i32, i32) {
    %c0_i32 = arith.constant 0 : i32
    %c0_i32_0 = arith.constant 0 : i32
    %c0_i32_1 = arith.constant 0 : i32
    return %c0_i32, %c0_i32_0 : i32, i32
  }
  func.func @transform_5(%arg0: i32) -> (i32, i32) {
    %c0_i32 = arith.constant 0 : i32
    %c0_i32_0 = arith.constant 0 : i32
    %c0_i32_1 = arith.constant 0 : i32
    return %c0_i32, %c0_i32_0 : i32, i32
  }
  func.func @transform_6(%arg0: i32) -> (i32, i32) {
    %c0_i32 = arith.constant 0 : i32
    %c0_i32_0 = arith.constant 0 : i32
    %c0_i32_1 = arith.constant 0 : i32
    return %c0_i32, %c0_i32_0 : i32, i32
  }
  func.func @transform_7(%arg0: i32) -> (i32, i32) {
    %c0_i32 = arith.constant 0 : i32
    %c0_i32_0 = arith.constant 0 : i32
    %c0_i32_1 = arith.constant 0 : i32
    return %c0_i32, %c0_i32_0 : i32, i32
  }
  func.func @transform_8(%arg0: i32) -> (i32, i32) {
    %c0_i32 = arith.constant 0 : i32
    %c0_i32_0 = arith.constant 0 : i32
    return %arg0, %c0_i32 : i32, i32
  }
}

</mosaic_0001>

<bundles_post_ra>
// kernel: tpu_custom_call.1
= control target key start
LH: loop header
LB: loop body
LE: loop exit
PB: predicated region body
PF: predicated region fallthrough
CT: control target
= control target key end

     0   :  { %14 = vsyncpa [#allocation4], 0  ;;  %s620_s0 = inlined_call_operand.hbm [shape: f32[8,8], index: 0, kind: input, shape index: {}]   ;;  %s621_s1 = inlined_call_operand.hbm [shape: f32[8,256], index: 1, kind: input, shape index: {}]   ;;  %s622_s2 = inlined_call_operand.vmem [shape: f32[1,256], index: 2, kind: input, shape index: {}]   ;;  %s623_s3 = inlined_call_operand.hbm [shape: f32[256,256], index: 3, kind: input, shape index: {}]   ;;  %s624_s4 = inlined_call_operand.vmem [shape: f32[1,256], index: 4, kind: input, shape index: {}]   ;;  %s625_s5 = inlined_call_operand.hbm [shape: f32[256,128], index: 5, kind: input, shape index: {}]   ;;  %s626_s6 = inlined_call_operand.vmem [shape: f32[1,128], index: 6, kind: input, shape index: {}]   ;;  %s627_s7 = inlined_call_operand.<no memory space> [shape: f32[1,1], index: 7, kind: input, shape index: {}]   ;;  %s628_s8 = inlined_call_operand.hbm [shape: f32[8,128], index: 8, kind: output, shape index: {}]  }
   0x1   :  { %15 = vsyncpa [#allocation7], 0 }
   0x2   :  { %16 = vsyncpa [#allocation10], 0  ;;  %s34_s29 = sshll.u32 %s621_s1, 4  ;;  %s35_s29 = int_to_ptr.hbm [resolvable:$true] %s34_s29 }
   0x3   :  { %17 = vsyncpa [#allocation5], 0  ;;  %s539_s30 = smov [#allocation6]   ;;  %s23_s12 = sshll.u32 %s620_s0, 4  ;;  %s24_s12 = int_to_ptr.hbm [resolvable:$true] %s23_s12 }
   0x4   :  { %s36_s9 = sshll.u32 %s539_s30, 4  ;;  %s540_s13 = smov [#allocation3]   ;;  %s37_s9 = int_to_ptr.vmem [resolvable:$true] %s36_s9 }
   0x5   :  { %39 = dma.hbm_to_vmem [thread:$0]  %s35_s29, 256, %s37_s9, [#allocation7]  }
   0x6   :  { %s25_s14 = sshll.u32 %s540_s13, 4  ;;  %s46_s17 = sshll.u32 %s623_s3, 4  ;;  %s26_s14 = int_to_ptr.vmem [resolvable:$true] %s25_s14  ;;  %s47_s17 = int_to_ptr.hbm [resolvable:$true] %s46_s17 }
   0x7   :  { %28 = dma.hbm_to_vmem [thread:$0]  %s24_s12, 128, %s26_s14, [#allocation4]  }
   0x8   :  { %s541_s1 = smov [#allocation8]   ;;  %s61_s21 = sshll.u32 %s625_s5, 4  ;;  %s62_s21 = int_to_ptr.hbm [resolvable:$true] %s61_s21 }
   0x9   :  { %s48_s18 = sshll.u32 %s541_s1, 4  ;;  %s542_s22 = smov 256   ;;  %s49_s18 = int_to_ptr.vmem [resolvable:$true] %s48_s18 }
   0xa   :  { %s543_s0 = smov 16   ;;  %s544_s23 = smov [#allocation9]  }
   0xb   :  { %54 = dma.hbm_to_vmem [thread:$0]  %s47_s17, 8192, %s49_s18, [#allocation7], %s542_s22, %s542_s22, %s543_s0  }
   0xc   :  { %s63_s24 = sshll.u32 %s544_s23, 4  ;;  %s545_s25 = smov 128   ;;  %s64_s24 = int_to_ptr.vmem [resolvable:$true] %s63_s24 }
   0xd   :  { %s546_s26 = smov 8  }
   0xe   :  { %69 = dma.hbm_to_vmem [thread:$0]  %s62_s21, 4096, %s64_s24, [#allocation10], %s545_s25, %s545_s25, %s546_s26  }
   0xf   :  { %531 = dma.done.wait [#allocation4], 128  }
  0x10   :  { %532 = vsyncadd [#allocation4], 4294967168 }
  0x11   :  { %533 = dma.done.wait [#allocation7], 8448  }
  0x12   :  { %534 = vsyncadd [#allocation7], 4294958848 }
  0x13   :  { %535 = dma.done.wait [#allocation10], 4096  }
  0x14   :  { %536 = vsyncadd [#allocation10], 4294963200  ;;  %vm99_vm0 = vcmask 64512   ;;  %v91_v0 = vld [vmem:[#allocation6] sm:$0xff]  ;;  %v90_v1 = vld [vmem:[#allocation3] sm:$0xff]  ;;  %s547_s9 = smov [#allocation11]  }
  0x15   :  { %v92_v2 = vld [vmem:[#allocation6 + $0x8] sm:$0xff]  ;;  %118 = vmatpush.msra.mxu0 %v91_v0  ;;  %v175_v3 = vld [vmem:[#allocation8 + $0xf0] sm:$0xff]  ;;  %v173_v5 = vld [vmem:[#allocation8 + $0xe0] sm:$0xff]  ;;  %s383_s10 = sshll.u32 %s547_s9, 4  ;;  %s385_s13 = sshll.u32 %s628_s8, 4  ;;  %s384_s10 = int_to_ptr.vmem [resolvable:$true] %s383_s10  ;;  %s386_s13 = int_to_ptr.hbm [resolvable:$true] %s385_s13 }
  0x16   :  { %138 = vmatpush.msra.mxu1 %v92_v2  ;;  %v176_v4 = vld [vmem:[#allocation8 + $0xf8] sm:$0xff]  ;;  %397 = vmatmul.msk.f32.vlgmr.msra.gmra.mxu0 %vm99_vm0, %v90_v1  ;;  %v207_v6 = vld [vmem:[#allocation8 + $0x1f0] sm:$0xff]  ;;  %v174_v7 = vld [vmem:[#allocation8 + $0xe8] sm:$0xff] }
  0x17   :  { %398 = vmatmul.msk.f32.vlgmr.msra.gmra.mxu1 %vm99_vm0, %v90_v1  ;;  %v208_v8 = vld [vmem:[#allocation8 + $0x1f8] sm:$0xff]  ;;  %215 = vmatpush.msra.mxu2 %v175_v3  ;;  %v205_v9 = vld [vmem:[#allocation8 + $0x1e0] sm:$0xff]  ;;  %v171_v10 = vld [vmem:[#allocation8 + $0xd0] sm:$0xff] }
  0x18   :  { %255 = vmatpush.msrb.mxu0 %v176_v4  ;;  %235 = vmatpush.msra.mxu3 %v207_v6  ;;  %v172_v11 = vld [vmem:[#allocation8 + $0xd8] sm:$0xff]  ;;  %v206_v12 = vld [vmem:[#allocation8 + $0x1e8] sm:$0xff]  ;;  %v203_v13 = vld [vmem:[#allocation8 + $0x1d0] sm:$0xff] }
  0x19   :  { %275 = vmatpush.msrb.mxu1 %v208_v8  ;;  %216 = vmatpush.msra.mxu2 %v173_v5  ;;  %v204_v14 = vld [vmem:[#allocation8 + $0x1d8] sm:$0xff]  ;;  %v169_v15 = vld [vmem:[#allocation8 + $0xc0] sm:$0xff]  ;;  %v170_v16 = vld [vmem:[#allocation8 + $0xc8] sm:$0xff] }
  0x1a   :  { %256 = vmatpush.msrb.mxu0 %v174_v7  ;;  %236 = vmatpush.msra.mxu3 %v205_v9  ;;  %v201_v17 = vld [vmem:[#allocation8 + $0x1c0] sm:$0xff]  ;;  %v202_v18 = vld [vmem:[#allocation8 + $0x1c8] sm:$0xff]  ;;  %v167_v19 = vld [vmem:[#allocation8 + $0xb0] sm:$0xff] }
  0x1b   :  { %276 = vmatpush.msrb.mxu1 %v206_v12  ;;  %217 = vmatpush.msra.mxu2 %v171_v10  ;;  %v168_v20 = vld [vmem:[#allocation8 + $0xb8] sm:$0xff]  ;;  %v199_v21 = vld [vmem:[#allocation8 + $0x1b0] sm:$0xff]  ;;  %v165_v23 = vld [vmem:[#allocation8 + $0xa0] sm:$0xff] }
  0x1c   :  { %257 = vmatpush.msrb.mxu0 %v172_v11  ;;  %237 = vmatpush.msra.mxu3 %v203_v13  ;;  %v200_v22 = vld [vmem:[#allocation8 + $0x1b8] sm:$0xff]  ;;  %v166_v24 = vld [vmem:[#allocation8 + $0xa8] sm:$0xff]  ;;  %v197_v25 = vld [vmem:[#allocation8 + $0x1a0] sm:$0xff] }
  0x1d   :  { %277 = vmatpush.msrb.mxu1 %v204_v14  ;;  %218 = vmatpush.msra.mxu2 %v169_v15  ;;  %v198_v26 = vld [vmem:[#allocation8 + $0x1a8] sm:$0xff]  ;;  %v163_v27 = vld [vmem:[#allocation8 + $0x90] sm:$0xff]  ;;  %v164_v28 = vld [vmem:[#allocation8 + $0x98] sm:$0xff] }
  0x1e   :  { %258 = vmatpush.msrb.mxu0 %v170_v16  ;;  %238 = vmatpush.msra.mxu3 %v201_v17  ;;  %v195_v29 = vld [vmem:[#allocation8 + $0x190] sm:$0xff]  ;;  %v196_v30 = vld [vmem:[#allocation8 + $0x198] sm:$0xff]  ;;  %v161_v31 = vld [vmem:[#allocation8 + $0x80] sm:$0xff] }
  0x1f   :  { %278 = vmatpush.msrb.mxu1 %v202_v18  ;;  %219 = vmatpush.msra.mxu2 %v167_v19  ;;  %v162_v32 = vld [vmem:[#allocation8 + $0x88] sm:$0xff]  ;;  %v193_v33 = vld [vmem:[#allocation8 + $0x180] sm:$0xff]  ;;  %v159_v35 = vld [vmem:[#allocation8 + $0x70] sm:$0xff] }
  0x20   :  { %259 = vmatpush.msrb.mxu0 %v168_v20  ;;  %239 = vmatpush.msra.mxu3 %v199_v21  ;;  %v194_v34 = vld [vmem:[#allocation8 + $0x188] sm:$0xff]  ;;  %v160_v36 = vld [vmem:[#allocation8 + $0x78] sm:$0xff]  ;;  %v191_v37 = vld [vmem:[#allocation8 + $0x170] sm:$0xff] }
  0x21   :  { %279 = vmatpush.msrb.mxu1 %v200_v22  ;;  %220 = vmatpush.msra.mxu2 %v165_v23  ;;  %v192_v38 = vld [vmem:[#allocation8 + $0x178] sm:$0xff]  ;;  %v157_v39 = vld [vmem:[#allocation8 + $0x60] sm:$0xff]  ;;  %v158_v40 = vld [vmem:[#allocation8 + $0x68] sm:$0xff] }
  0x22   :  { %260 = vmatpush.msrb.mxu0 %v166_v24  ;;  %240 = vmatpush.msra.mxu3 %v197_v25  ;;  %v189_v41 = vld [vmem:[#allocation8 + $0x160] sm:$0xff]  ;;  %v190_v42 = vld [vmem:[#allocation8 + $0x168] sm:$0xff]  ;;  %v155_v43 = vld [vmem:[#allocation8 + $0x50] sm:$0xff] }
  0x23   :  { %280 = vmatpush.msrb.mxu1 %v198_v26  ;;  %221 = vmatpush.msra.mxu2 %v163_v27  ;;  %v156_v44 = vld [vmem:[#allocation8 + $0x58] sm:$0xff]  ;;  %v187_v45 = vld [vmem:[#allocation8 + $0x150] sm:$0xff]  ;;  %v153_v47 = vld [vmem:[#allocation8 + $0x40] sm:$0xff] }
  0x24   :  { %261 = vmatpush.msrb.mxu0 %v164_v28  ;;  %241 = vmatpush.msra.mxu3 %v195_v29  ;;  %v188_v46 = vld [vmem:[#allocation8 + $0x158] sm:$0xff]  ;;  %v154_v48 = vld [vmem:[#allocation8 + $0x48] sm:$0xff]  ;;  %v185_v49 = vld [vmem:[#allocation8 + $0x140] sm:$0xff] }
  0x25   :  { %281 = vmatpush.msrb.mxu1 %v196_v30  ;;  %222 = vmatpush.msra.mxu2 %v161_v31  ;;  %v186_v50 = vld [vmem:[#allocation8 + $0x148] sm:$0xff]  ;;  %v151_v51 = vld [vmem:[#allocation8 + $0x30] sm:$0xff]  ;;  %v152_v52 = vld [vmem:[#allocation8 + $0x38] sm:$0xff] }
  0x26   :  { %262 = vmatpush.msrb.mxu0 %v162_v32  ;;  %242 = vmatpush.msra.mxu3 %v193_v33  ;;  %v149_v53 = vld [vmem:[#allocation8 + $0x20] sm:$0xff]  ;;  %v183_v54 = vld [vmem:[#allocation8 + $0x130] sm:$0xff]  ;;  %v150_v55 = vld [vmem:[#allocation8 + $0x28] sm:$0xff] }
  0x27   :  { %282 = vmatpush.msrb.mxu1 %v194_v34  ;;  %223 = vmatpush.msra.mxu2 %v159_v35  ;;  %v184_v56 = vld [vmem:[#allocation8 + $0x138] sm:$0xff]  ;;  %v147_v57 = vld [vmem:[#allocation8 + $0x10] sm:$0xff]  ;;  %v181_v58 = vld [vmem:[#allocation8 + $0x120] sm:$0xff] }
  0x28   :  { %263 = vmatpush.msrb.mxu0 %v160_v36  ;;  %243 = vmatpush.msra.mxu3 %v191_v37  ;;  %v148_v59 = vld [vmem:[#allocation8 + $0x18] sm:$0xff]  ;;  %v182_v60 = vld [vmem:[#allocation8 + $0x128] sm:$0xff]  ;;  %v145_v61 = vld [vmem:[#allocation8] sm:$0xff] }
  0x29   :  { %283 = vmatpush.msrb.mxu1 %v192_v38  ;;  %224 = vmatpush.msra.mxu2 %v157_v39  ;;  %v179_v62 = vld [vmem:[#allocation8 + $0x110] sm:$0xff]  ;;  %v146_v63 = vld [vmem:[#allocation8 + $0x8] sm:$0xff]  ;;  %v180_v0 = vld [vmem:[#allocation8 + $0x118] sm:$0xff] }
  0x2a   :  { %264 = vmatpush.msrb.mxu0 %v158_v40  ;;  %244 = vmatpush.msra.mxu3 %v189_v41  ;;  %v177_v1 = vld [vmem:[#allocation8 + $0x100] sm:$0xff]  ;;  %v178_v2 = vld [vmem:[#allocation8 + $0x108] sm:$0xff]  ;;  %v328_v3 = vld [vmem:[#allocation9 + $0xf8] sm:$0xff] }
  0x2b   :  { %284 = vmatpush.msrb.mxu1 %v190_v42  ;;  %225 = vmatpush.msra.mxu2 %v155_v43  ;;  %v327_v4 = vld [vmem:[#allocation9 + $0xf0] sm:$0xff]  ;;  %v312_v5 = vld [vmem:[#allocation9 + $0x78] sm:$0xff]  ;;  %v326_v7 = vld [vmem:[#allocation9 + $0xe8] sm:$0xff] }
  0x2c   :  { %265 = vmatpush.msrb.mxu0 %v156_v44  ;;  %245 = vmatpush.msra.mxu3 %v187_v45  ;;  %v311_v6 = vld [vmem:[#allocation9 + $0x70] sm:$0xff]  ;;  %v310_v8 = vld [vmem:[#allocation9 + $0x68] sm:$0xff]  ;;  %v325_v9 = vld [vmem:[#allocation9 + $0xe0] sm:$0xff] }
  0x2d   :  { %285 = vmatpush.msrb.mxu1 %v188_v46  ;;  %226 = vmatpush.msra.mxu2 %v153_v47  ;;  %v309_v10 = vld [vmem:[#allocation9 + $0x60] sm:$0xff]  ;;  %v324_v11 = vld [vmem:[#allocation9 + $0xd8] sm:$0xff]  ;;  %v323_v13 = vld [vmem:[#allocation9 + $0xd0] sm:$0xff] }
  0x2e   :  { %266 = vmatpush.msrb.mxu0 %v154_v48  ;;  %246 = vmatpush.msra.mxu3 %v185_v49  ;;  %v308_v12 = vld [vmem:[#allocation9 + $0x58] sm:$0xff]  ;;  %v307_v14 = vld [vmem:[#allocation9 + $0x50] sm:$0xff]  ;;  %v322_v15 = vld [vmem:[#allocation9 + $0xc8] sm:$0xff] }
  0x2f   :  { %286 = vmatpush.msrb.mxu1 %v186_v50  ;;  %227 = vmatpush.msra.mxu2 %v151_v51  ;;  %v306_v16 = vld [vmem:[#allocation9 + $0x48] sm:$0xff]  ;;  %v321_v17 = vld [vmem:[#allocation9 + $0xc0] sm:$0xff]  ;;  %v320_v19 = vld [vmem:[#allocation9 + $0xb8] sm:$0xff] }
  0x30   :  { %267 = vmatpush.msrb.mxu0 %v152_v52  ;;  %247 = vmatpush.msra.mxu3 %v183_v54  ;;  %v305_v18 = vld [vmem:[#allocation9 + $0x40] sm:$0xff]  ;;  %v304_v20 = vld [vmem:[#allocation9 + $0x38] sm:$0xff]  ;;  %v319_v21 = vld [vmem:[#allocation9 + $0xb0] sm:$0xff] }
  0x31   :  { %228 = vmatpush.msra.mxu2 %v149_v53  ;;  %287 = vmatpush.msrb.mxu1 %v184_v56  ;;  %v318_v22 = vld [vmem:[#allocation9 + $0xa8] sm:$0xff]  ;;  %v317_v24 = vld [vmem:[#allocation9 + $0xa0] sm:$0xff]  ;;  %v303_v33 = vld [vmem:[#allocation9 + $0x30] sm:$0xff] }
  0x32   :  { %268 = vmatpush.msrb.mxu0 %v150_v55  ;;  %248 = vmatpush.msra.mxu3 %v181_v58  ;;  %v93_v23 = vld [vmem:[%s622_s2] sm:$0x3]  ;;  %v316_v34 = vld [vmem:[#allocation9 + $0x98] sm:$0xff]  ;;  %v315_v36 = vld [vmem:[#allocation9 + $0x90] sm:$0xff] }
  0x33   :  { %229 = vmatpush.msra.mxu2 %v147_v57  ;;  %288 = vmatpush.msrb.mxu1 %v182_v60  ;;  %v95_v25 = vperm.slane %v93_v23, 0  ;;  %v96_v26 = vperm.slane %v93_v23, 1  ;;  %v302_v35 = vld [vmem:[#allocation9 + $0x28] sm:$0xff]  ;;  %v301_v37 = vld [vmem:[#allocation9 + $0x20] sm:$0xff]  ;;  %v300_v39 = vld [vmem:[#allocation9 + $0x18] sm:$0xff] }
  0x34   :  { %269 = vmatpush.msrb.mxu0 %v148_v59  ;;  %249 = vmatpush.msra.mxu3 %v179_v62  ;;  %v314_v38 = vld [vmem:[#allocation9 + $0x88] sm:$0xff]  ;;  %v313_v40 = vld [vmem:[#allocation9 + $0x80] sm:$0xff]  ;;  %v299_v41 = vld [vmem:[#allocation9 + $0x10] sm:$0xff]  ;;  %v375_v62 = vstv %s627_s7 }
  0x35   :  { %230 = vmatpush.msra.mxu2 %v145_v61  ;;  %289 = vmatpush.msrb.mxu1 %v180_v0  ;;  %v298_v42 = vld [vmem:[#allocation9 + $0x8] sm:$0xff]  ;;  %v297_v43 = vld [vmem:[#allocation9] sm:$0xff] }
  0x36   :  { %270 = vmatpush.msrb.mxu0 %v146_v63  ;;  %250 = vmatpush.msra.mxu3 %v177_v1  ;;  %v209_v44 = vld [vmem:[%s624_s4] sm:$0x3] }
  0x37   :  { %290 = vmatpush.msrb.mxu1 %v178_v2  ;;  %333 = vmatpush.msrb.mxu2 %v312_v5  ;;  %v212_v45 = vperm.slane %v209_v44, 1  ;;  %v211_v50 = vperm.slane %v209_v44, 0  ;;  %v408_v57 = vld [vmem:[%s626_s6] ss:$0 sm:$0xff] }
  0x38   :  { %353 = vmatpush.msrb.mxu3 %v328_v3 }
  0x39   :  { %334 = vmatpush.msrb.mxu2 %v311_v6 }
  0x3a   :  { %354 = vmatpush.msrb.mxu3 %v327_v4 }
  0x3b   :  { %335 = vmatpush.msrb.mxu2 %v310_v8 }
  0x3c   :  { %355 = vmatpush.msrb.mxu3 %v326_v7 }
  0x3d   :  { %336 = vmatpush.msrb.mxu2 %v309_v10 }
  0x3e   :  { %356 = vmatpush.msrb.mxu3 %v325_v9 }
  0x3f   :  { %337 = vmatpush.msrb.mxu2 %v308_v12 }
  0x40   :  { %357 = vmatpush.msrb.mxu3 %v324_v11 }
  0x41   :  { %338 = vmatpush.msrb.mxu2 %v307_v14 }
  0x42   :  { %358 = vmatpush.msrb.mxu3 %v323_v13 }
  0x43   :  { %339 = vmatpush.msrb.mxu2 %v306_v16 }
  0x44   :  { %359 = vmatpush.msrb.mxu3 %v322_v15 }
  0x45   :  { %340 = vmatpush.msrb.mxu2 %v305_v18 }
  0x46   :  { %360 = vmatpush.msrb.mxu3 %v321_v17 }
  0x47   :  { %341 = vmatpush.msrb.mxu2 %v304_v20 }
  0x48   :  { %361 = vmatpush.msrb.mxu3 %v320_v19 }
  0x49   :  { %342 = vmatpush.msrb.mxu2 %v303_v33 }
  0x4a   :  { %362 = vmatpush.msrb.mxu3 %v319_v21 }
  0x4b   :  { %343 = vmatpush.msrb.mxu2 %v302_v35 }
  0x4c   :  { %363 = vmatpush.msrb.mxu3 %v318_v22 }
  0x4d   :  { %344 = vmatpush.msrb.mxu2 %v301_v37 }
  0x4e   :  { %364 = vmatpush.msrb.mxu3 %v317_v24 }
  0x4f   :  { %345 = vmatpush.msrb.mxu2 %v300_v39 }
  0x50   :  { %365 = vmatpush.msrb.mxu3 %v316_v34 }
  0x51   :  { %346 = vmatpush.msrb.mxu2 %v299_v41 }
  0x52   :  { %366 = vmatpush.msrb.mxu3 %v315_v36 }
  0x53   :  { %347 = vmatpush.msrb.mxu2 %v298_v42 }
  0x54   :  { %367 = vmatpush.msrb.mxu3 %v314_v38 }
  0x55   :  { %348 = vmatpush.msrb.mxu2 %v297_v43 }
  0x56   :  { %368 = vmatpush.msrb.mxu3 %v313_v40 }
  0x93   :  { %v120_v27 = vpop.f32.mrf.mxu0 }
  0x94   :  { %v140_v28 = vpop.f32.mrf.mxu1  ;;  %v121_v29 = vadd.f32 %v120_v27, %v95_v25 }
  0x95   :  { %v141_v30 = vadd.f32 %v140_v28, %v96_v26 }
  0x96   :  { %v143_v31 = vmax.f32 %v121_v29, 0.0 }
  0x97   :  { %v144_v32 = vmax.f32 %v141_v30, 0.0 }
  0x98   :  { %231 = vmatmul.f32.vlgmr.msra.gmra.mxu2 %v143_v31  ;;  %271 = vmatmul.f32.vlgmr.msrb.gmra.mxu0 %v143_v31 }
  0x99   :  { %251 = vmatmul.f32.vlgmr.msra.gmra.mxu3 %v144_v32  ;;  %291 = vmatmul.f32.vlgmr.msrb.gmra.mxu1 %v144_v32 }
 0x115   :  { %v272_v46 = vpop.f32.mrf.mxu0 }
 0x116   :  { %v273_v47 = vadd.f32 %v272_v46, %v212_v45  ;;  %v292_v48 = vpop.f32.mrf.mxu1 }
 0x118   :  { %v293_v49 = vadd.f32 %v292_v48, %v273_v47 }
 0x11a   :  { %v296_v51 = vmax.f32 %v293_v49, 0.0 }
 0x11b   :  { %v232_v52 = vpop.f32.mrf.mxu2 }
 0x11c   :  { %v233_v53 = vadd.f32 %v232_v52, %v211_v50  ;;  %369 = vmatmul.f32.vlgmr.msrb.gmra.mxu3 %v296_v51  ;;  %v252_v54 = vpop.f32.mrf.mxu3 }
 0x11e   :  { %v253_v55 = vadd.f32 %v252_v54, %v233_v53 }
 0x120   :  { %v295_v56 = vmax.f32 %v253_v55, 0.0 }
 0x122   :  { %349 = vmatmul.f32.vlgmr.msrb.gmra.mxu2 %v295_v56 }
 0x19f   :  { %v370_v60 = vpop.f32.mrf.mxu3 }
 0x1a5   :  { %v350_v58 = vpop.f32.mrf.mxu2 }
 0x1a6   :  { %v351_v59 = vadd.f32 %v408_v57, %v350_v58 }
 0x1a8   :  { %v371_v61 = vadd.f32 %v370_v60, %v351_v59 }
 0x1aa   :  { %409 = vtanh.f32 %v371_v61 }
 0x1b0   :  { %v410_v63 = vpop.eup %409 }
 0x1b1   :  { %v376_v0 = vmul.f32 %v410_v63, %v375_v62 }
 0x1b3   :  { %377 = vst [vmem:[#allocation11] sm:$0xff] %v376_v0 }
 0x1b4   :  { %388 = dma.vmem_to_hbm [thread:$0]  %s384_s10, 128, %s386_s13, [#allocation5]  }
 0x1b5   :  { %537 = dma.done.wait [#allocation5], 128  }
 0x1b6   :  { %538 = vsyncadd [#allocation5], 4294967168 }
 0x1b7   :  { %393 = vsyncpa [#allocation4], 1 }
 0x1b8   :  { %394 = vsyncpa [#allocation7], 1 }
 0x1b9   :  { %395 = vsyncpa [#allocation10], 1 }
 0x1ba   :  { %396 = vsyncpa [#allocation5], 1 }

</bundles_post_ra>
